<compile_context>
chip_gen: v7x
topology: tpu7x:2x2x1
jax: 0.10.0
libtpu: 0.0.40
codegen_flags: <defaults>
</compile_context>

<pallas_src>
import jax
import jax.numpy as jnp
from jax import lax
from jax.experimental import pallas as pl
from jax.experimental.pallas import tpu as pltpu

N_OUT = 5           # Linear(n_adf, 5)
NEG_SLOPE = 0.01    # F.leaky_relu default negative_slope

# v5e-safe max lane tile: x buf 16384*32*4 = 2 MiB, out buf 320 KiB,
# ~5 MiB total double-buffered << 16 MiB scoped-VMEM default.
_TB_MAX = 16384
_SPLIT_THRESHOLD = 256   # below this, a single full-extent block is best


def adf_l_kernel(x_ref, w_ref, b_ref, ot_ref):
    x = x_ref[...]                                     # (tb, n_adf), natural layout
    w = w_ref[...]                                     # (N_OUT, n_adf)
    b = b_ref[...]                                     # (N_OUT, 1)

    # zT = W @ x^T + bias -> (N_OUT, tb): contract n_adf against n_adf
    # ("trans_b" on the MXU).  Batch sits on the 128-lane axis, so everything
    # downstream (leaky_relu, exp, softmax normalization, store) is lane-dense.
    z = lax.dot_general(w, x, (((1,), (1,)), ((), ())),
                        preferred_element_type=jnp.float32) + b

    # leaky_relu (slope 0.01 in (0,1)) == max(z, slope*z): single vmax.
    z = jnp.maximum(z, NEG_SLOPE * z)

    # Numerically stable softmax over the 5 classes (axis 0 here == torch
    # dim=1): one sublane reduce per vreg column, no unrolled temporaries.
    m = jnp.max(z, axis=0, keepdims=True)              # (1, tb)
    e = jnp.exp(z - m)                                 # (N_OUT, tb), EUP
    denom = jnp.sum(e, axis=0, keepdims=True)          # (1, tb)

    # EUP approximate reciprocal + one Newton-Raphson step -> f32 accuracy.
    r = pl.reciprocal(denom, approx=True)
    r = r * (2.0 - denom * r)

    ot_ref[...] = (e * r).astype(ot_ref.dtype)


def _pick_batch_tile(B: int) -> int:
    if B < _SPLIT_THRESHOLD:
        # Single full-extent block (always layout-legal, minimal overhead).
        return B
    # Aim for >= 2 grid steps (v7x megacore), 128-aligned lanes, capped so the
    # double-buffered working set stays well inside v5e's scoped-VMEM default.
    half = pl.cdiv(B, 2)
    return min(_TB_MAX, ((half + 127) // 128) * 128)


@jax.jit
def adf_l_forward(adf_in, weight, bias):
    """adf_in: (B, n_adf); weight: (N_OUT, n_adf) torch layout; bias: (N_OUT,)."""
    B, n_adf = adf_in.shape
    tb = _pick_batch_tile(B)
    grid = (pl.cdiv(B, tb),)

    b_col = bias.reshape(N_OUT, 1)                     # (N_OUT, 1)

    cost = pl.CostEstimate(
        flops=2 * B * n_adf * N_OUT,
        transcendentals=(N_OUT + 1) * B,               # exps + reciprocal
        bytes_accessed=4 * (B * n_adf + B * N_OUT + n_adf * N_OUT + N_OUT),
    )

    out_t = pl.pallas_call(
        adf_l_kernel,
        out_shape=jax.ShapeDtypeStruct((N_OUT, B), jnp.float32),
        grid=grid,
        in_specs=[
            pl.BlockSpec((tb, n_adf), lambda i: (i, 0)),     # x tile, natural layout
            pl.BlockSpec((N_OUT, n_adf), lambda i: (0, 0)),  # W resident
            pl.BlockSpec((N_OUT, 1), lambda i: (0, 0)),      # bias resident
        ],
        out_specs=pl.BlockSpec((N_OUT, tb), lambda i: (0, i)),  # lane-dense store
        compiler_params=pltpu.CompilerParams(
            dimension_semantics=("parallel",)),
        cost_estimate=cost,
    )(adf_in, weight, b_col)

    # Torch-layout (B, 5) result.  If the consumer can take (N_OUT, B), return
    # out_t directly and drop this (tiny) extra pass.
    return out_t.T


if __name__ == "__main__":
    key = jax.random.PRNGKey(0)
    k_x, k_w, k_b = jax.random.split(key, 3)

    B, n_adf = 8, 32

    # Deterministic synthetic parameters (torch Linear default init style:
    # uniform in +/- 1/sqrt(n_adf)).
    bound = 1.0 / jnp.sqrt(jnp.float32(n_adf))
    weight = jax.random.uniform(k_w, (N_OUT, n_adf), jnp.float32, -bound, bound)
    bias = jax.random.uniform(k_b, (N_OUT,), jnp.float32, -bound, bound)
    adf_in = jax.random.normal(k_x, (B, n_adf), jnp.float32)

    out = adf_l_forward(adf_in, weight, bias)
    out = jax.block_until_ready(out)

    # Pure-JAX reference (same math as the torch module).
    z_ref = adf_in @ weight.T + bias
    z_ref = jnp.where(z_ref >= 0, z_ref, NEG_SLOPE * z_ref)
    ref = jax.nn.softmax(z_ref, axis=1)

    assert out.shape == (B, N_OUT)
    assert jnp.allclose(out, ref, atol=1e-5, rtol=1e-5), float(
        jnp.max(jnp.abs(out - ref)))

    print("KERNEL_OK")
</pallas_src>

<mosaic_0001>
module attributes {stable_mosaic.version = 11 : i64} {
  func.func @adf_l_kernel(%arg0: i32, %arg1: memref<8x32xf32, #tpu.memory_space<vmem>>, %arg2: memref<5x32xf32, #tpu.memory_space<vmem>>, %arg3: memref<5x1xf32, #tpu.memory_space<vmem>>, %arg4: memref<5x8xf32, #tpu.memory_space<vmem>>) attributes {dimension_semantics = [#tpu.dimension_semantics<parallel>], iteration_bounds = array<i64: 1>, scalar_prefetch = 0 : i64, scratch_operands = 0 : i64, tpu.core_type = #tpu.core_type<tc>, window_params = [{transform_indices = @transform_0, window_bounds = array<i64: 8, 32>}, {pipeline_mode = #tpu.pipeline_mode<synchronous>, transform_indices = @transform_1, window_bounds = array<i64: 5, 32>}, {pipeline_mode = #tpu.pipeline_mode<synchronous>, transform_indices = @transform_2, window_bounds = array<i64: 5, 1>}, {transform_indices = @transform_3, window_bounds = array<i64: 5, 8>}]} {
    %c0 = arith.constant 0 : index
    %c0_0 = arith.constant 0 : index
    %0 = vector.load %arg1[%c0, %c0_0] : memref<8x32xf32, #tpu.memory_space<vmem>>, vector<8x32xf32>
    %c0_1 = arith.constant 0 : index
    %c0_2 = arith.constant 0 : index
    %1 = vector.load %arg2[%c0_1, %c0_2] : memref<5x32xf32, #tpu.memory_space<vmem>>, vector<5x32xf32>
    %c0_3 = arith.constant 0 : index
    %c0_4 = arith.constant 0 : index
    %2 = vector.load %arg3[%c0_3, %c0_4] : memref<5x1xf32, #tpu.memory_space<vmem>>, vector<5x1xf32>
    %cst = arith.constant dense<0.000000e+00> : vector<5x8xf32>
    %3 = tpu.matmul %1, %0, %cst {dimension_numbers = #tpu.dot_dimension_numbers<[1], [1], [0], [0], [0, 0, 1, 0], [], []>} : vector<5x32xf32>, vector<8x32xf32>, vector<5x8xf32> -> vector<5x8xf32>
    %4 = vector.broadcast %2 : vector<5x1xf32> to vector<5x8xf32>
    %5 = arith.addf %3, %4 : vector<5x8xf32>
    %cst_5 = arith.constant 0.00999999977 : f32
    %6 = vector.broadcast %cst_5 : f32 to vector<5x8xf32>
    %7 = arith.mulf %6, %5 : vector<5x8xf32>
    %8 = arith.maximumf %5, %7 : vector<5x8xf32>
    %cst_6 = arith.constant dense<0xFF800000> : vector<8xf32>
    %9 = vector.multi_reduction <maximumf>, %8, %cst_6 [0] : vector<5x8xf32> to vector<8xf32>
    %10 = vector.shape_cast %9 : vector<8xf32> to vector<1x8xf32>
    %11 = vector.broadcast %10 : vector<1x8xf32> to vector<5x8xf32>
    %12 = arith.subf %8, %11 : vector<5x8xf32>
    %13 = math.exp %12 : vector<5x8xf32>
    %cst_7 = arith.constant dense<0.000000e+00> : vector<8xf32>
    %14 = vector.multi_reduction <add>, %13, %cst_7 [0] : vector<5x8xf32> to vector<8xf32>
    %15 = vector.shape_cast %14 : vector<8xf32> to vector<1x8xf32>
    %16 = tpu.reciprocal %15 {approx = true} : vector<1x8xf32> -> vector<1x8xf32>
    %17 = arith.mulf %15, %16 : vector<1x8xf32>
    %cst_8 = arith.constant 2.000000e+00 : f32
    %18 = vector.broadcast %cst_8 : f32 to vector<1x8xf32>
    %19 = arith.subf %18, %17 : vector<1x8xf32>
    %20 = arith.mulf %16, %19 : vector<1x8xf32>
    %21 = vector.broadcast %20 : vector<1x8xf32> to vector<5x8xf32>
    %22 = arith.mulf %13, %21 : vector<5x8xf32>
    %c0_9 = arith.constant 0 : index
    %c0_10 = arith.constant 0 : index
    %23 = vector.load %arg4[%c0_9, %c0_10] : memref<5x8xf32, #tpu.memory_space<vmem>>, vector<5x8xf32>
    tpu.vector_store %arg4[%c0_9, %c0_10], %22 {strides = array<i32>} : memref<5x8xf32, #tpu.memory_space<vmem>>, vector<5x8xf32>,
    return
  }
  func.func @transform_0(%arg0: i32) -> (i32, i32) {
    %c0_i32 = arith.constant 0 : i32
    %c0_i32_0 = arith.constant 0 : i32
    return %arg0, %c0_i32 : i32, i32
  }
  func.func @transform_1(%arg0: i32) -> (i32, i32) {
    %c0_i32 = arith.constant 0 : i32
    %c0_i32_0 = arith.constant 0 : i32
    %c0_i32_1 = arith.constant 0 : i32
    return %c0_i32, %c0_i32_0 : i32, i32
  }
  func.func @transform_2(%arg0: i32) -> (i32, i32) {
    %c0_i32 = arith.constant 0 : i32
    %c0_i32_0 = arith.constant 0 : i32
    %c0_i32_1 = arith.constant 0 : i32
    return %c0_i32, %c0_i32_0 : i32, i32
  }
  func.func @transform_3(%arg0: i32) -> (i32, i32) {
    %c0_i32 = arith.constant 0 : i32
    %c0_i32_0 = arith.constant 0 : i32
    return %c0_i32, %arg0 : i32, i32
  }
}

</mosaic_0001>

<bundles_post_ra>
// kernel: adf_l_forward.1
= control target key start
LH: loop header
LB: loop body
LE: loop exit
PB: predicated region body
PF: predicated region fallthrough
CT: control target
= control target key end

     0   :  { %vm22_vm0 = vcmask 261120   ;;  %v146_v0 = vmov 0.0   ;;  %vm147_vm1 = vmmov 0   ;;  %v148_v4 = vmov 0   ;;  %s184_s0 = inlined_call_operand.vmem [shape: f32[8,32], index: 0, kind: input, shape index: {}]   ;;  %s185_s1 = inlined_call_operand.vmem [shape: f32[5,32], index: 1, kind: input, shape index: {}]   ;;  %s186_s2 = inlined_call_operand.vmem [shape: f32[5,1], index: 2, kind: input, shape index: {}]   ;;  %s187_s3 = inlined_call_operand.vmem [shape: f32[5,8], index: 3, kind: output, shape index: {}]  }
   0x1   :  { %133 = vmatprep.subr.mxu0 %v146_v0  ;;  %v14_v1 = vld [vmem:[%s184_s0] sm:$0xff]  ;;  %135 = vmatprep.mubr.msk.f32.mxu0 %vm147_vm1, %v146_v0  ;;  %vm101_vm2 = vcmask 61440  }
   0x2   :  { %v16_v2 = vld [vmem:[%s186_s2] sm:$0x1f]  ;;  %134 = vmatpush3.xpose.msk.msra.mxu0 %vm22_vm0, %v14_v1  ;;  %141 = vset.pattern.permute.xlu0 %v148_v4 }
   0x3   :  { %v15_v3 = vld [vmem:[%s185_s1] sm:$0x1f]  ;;  %19 = vperm.xlu0 %141, %v16_v2  }
   0x5   :  { %136 = vmatmul.mubr.msk.f32.vlgmr.msra.gmra.mrb[0].mxu0 %vm22_vm0, %v15_v3 }
  0x82   :  { %v20_v5 = vpop.permute.xlu0 %19 }
  0xd8   :  { %v95_v6 = vpop.f32.mrb[0].mxu0 }
  0xd9   :  { %v96_v7 = vadd.f32 %v95_v6, %v20_v5  ;;  %v137_v8 = vpop.f32.mrb[1].mxu0 }
  0xdb   :  { %v99_v9 = vmul.f32 0.01, %v96_v7 }
  0xdd   :  { %v100_v10 = vmax.f32 %v96_v7, %v99_v9 }
  0xdf   :  { %v102_v11 = vsel %vm101_vm2, %v100_v10, -inf }
  0xe0   :  { %v103_v12 = vrot.slane %v102_v11, 4 }
  0xe2   :  { %v104_v13 = vmax.f32 %v102_v11, %v103_v12 }
  0xe4   :  { %v105_v14 = vrot.slane %v104_v13, 2 }
  0xe6   :  { %v106_v15 = vmax.f32 %v104_v13, %v105_v14 }
  0xe8   :  { %v107_v16 = vrot.slane %v106_v15, 1 }
  0xea   :  { %v108_v17 = vmax.f32 %v106_v15, %v107_v16 }
  0xec   :  { %v109_v18 = vsub.f32 %v100_v10, %v108_v17 }
  0xee   :  { %v110_v19 = vmul.f32 1.442695, %v109_v18 }
  0xf0   :  { %142 = vpow2.f32 %v110_v19 }
  0xfa   :  { %v143_v20 = vpop.eup %142 }
  0xfb   :  { %v112_v21 = vsel %vm101_vm2, %v143_v20, 0.0 }
  0xfc   :  { %v113_v22 = vrot.slane %v112_v21, 4 }
  0xfe   :  { %v114_v23 = vadd.f32 %v113_v22, %v112_v21 }
 0x100   :  { %v115_v24 = vrot.slane %v114_v23, 2 }
 0x102   :  { %v116_v25 = vadd.f32 %v115_v24, %v114_v23 }
 0x104   :  { %v117_v26 = vrot.slane %v116_v25, 1 }
 0x106   :  { %v118_v27 = vadd.f32 %v117_v26, %v116_v25 }
 0x108   :  { %144 = vrcp.f32 %v118_v27 }
 0x112   :  { %v145_v28 = vpop.eup %144 }
 0x113   :  { %v120_v29 = vmul.f32 %v145_v28, %v118_v27 }
 0x115   :  { %v121_v30 = vsub.f32 2.0, %v120_v29 }
 0x117   :  { %v122_v31 = vmul.f32 %v145_v28, %v121_v30 }
 0x119   :  { %v123_v32 = vmul.f32 %v143_v20, %v122_v31 }
 0x11b   :  { %124 = vst.msk [vmem:[%s187_s3] sm:$0x1f] %vm101_vm2, %v123_v32 }

</bundles_post_ra>
